<compile_context>
chip_gen: v6e
topology: v6e:2x2x1
jax: 0.10.0
libtpu: 0.0.40
codegen_flags: <defaults>
</compile_context>

<pallas_src>
import numpy as np
import jax
import jax.numpy as jnp
from jax.experimental import pallas as pl
from jax.experimental.pallas import tpu as pltpu


def _ccbn_kernel(x_ref, yt_ref, ws_ref, wh_ref, g_ref, b_ref, o_ref):
    # x_ref : (N, Cblk, HW)  activations, spatial flattened on the lane axis
    # yt_ref: (Din, N)       conditioning vectors (class embedding + noise), transposed
    # ws_ref: (Cblk, Din)    spectral-normalized class-scale Linear weight (PyTorch layout)
    # wh_ref: (Cblk, Din)    spectral-normalized class-shift Linear weight
    # g_ref : (Cblk, 1)      BatchNorm2d affine weight (gamma)
    # b_ref : (Cblk, 1)      BatchNorm2d affine bias  (beta)
    # o_ref : (N, Cblk, HW)
    n_b, cblk, hw = x_ref.shape
    inv_cnt = 1.0 / float(n_b * hw)
    eps = 1e-5

    # ---- per-channel batch statistics (training-mode BatchNorm2d, biased variance) ----
    xs = [x_ref[n] for n in range(n_b)]                       # each (Cblk, HW)
    s1 = jnp.zeros((cblk, 1), dtype=jnp.float32)
    s2 = jnp.zeros((cblk, 1), dtype=jnp.float32)
    for xn in xs:
        s1 = s1 + jnp.sum(xn, axis=1, keepdims=True)
        s2 = s2 + jnp.sum(xn * xn, axis=1, keepdims=True)
    mean = s1 * inv_cnt                                        # (Cblk, 1)
    var = s2 * inv_cnt - mean * mean
    inv_std = jax.lax.rsqrt(var + eps)                         # (Cblk, 1)

    # fold the BN affine into a per-channel scale / offset
    g_inv = g_ref[...] * inv_std                               # gamma / sqrt(var + eps)
    base_shift = b_ref[...] - g_inv * mean                     # beta - gamma*mean/sqrt(var+eps)

    # ---- class-conditional scale / shift for all batch elements at once (MXU) ----
    yt = yt_ref[...]                                           # (Din, N)
    scale_all = 1.0 + jnp.dot(ws_ref[...], yt,
                              preferred_element_type=jnp.float32)   # (Cblk, N)
    shift_all = jnp.dot(wh_ref[...], yt,
                        preferred_element_type=jnp.float32)         # (Cblk, N)

    # ---- apply: out[n, c, :] = a[n, c] * x[n, c, :] + b[n, c]  (single fused FMA) ----
    for n in range(n_b):
        s_n = scale_all[:, n:n + 1]                            # (Cblk, 1)
        a = s_n * g_inv
        b = s_n * base_shift + shift_all[:, n:n + 1]
        o_ref[n] = (a * xs[n] + b).astype(o_ref.dtype)


def class_conditional_batchnorm2d(x_nchw, y, w_scale, w_shift, bn_gamma, bn_beta,
                                  *, c_block=None):
    """x: (N, C, H, W); y: (N, Din); w_scale / w_shift: (C, Din) PyTorch Linear weights
    (already spectral-normalized); bn_gamma / bn_beta: (C,)."""
    N, C, H, W = x_nchw.shape
    Din = y.shape[1]
    HW = H * W
    if c_block is None:
        c_block = C                      # all channels in one grid step at these sizes
    assert C % c_block == 0 and (c_block == C or c_block % 8 == 0)

    # --- glue: flatten spatial onto the lane axis; reshape parameters (plain JAX) ---
    x_k = x_nchw.reshape(N, C, HW).astype(jnp.float32)
    yt_k = jnp.transpose(y, (1, 0)).astype(jnp.float32)        # (Din, N)
    ws_k = w_scale.astype(jnp.float32)                         # (C, Din)
    wh_k = w_shift.astype(jnp.float32)
    g_k = bn_gamma.reshape(C, 1).astype(jnp.float32)
    b_k = bn_beta.reshape(C, 1).astype(jnp.float32)

    out_flat = pl.pallas_call(
        _ccbn_kernel,
        out_shape=jax.ShapeDtypeStruct((N, C, HW), jnp.float32),
        grid_spec=pltpu.PrefetchScalarGridSpec(
            num_scalar_prefetch=0,
            grid=(C // c_block,),
            in_specs=[
                pl.BlockSpec((N, c_block, HW), lambda c: (0, c, 0)),
                pl.BlockSpec((Din, N), lambda c: (0, 0)),
                pl.BlockSpec((c_block, Din), lambda c: (c, 0)),
                pl.BlockSpec((c_block, Din), lambda c: (c, 0)),
                pl.BlockSpec((c_block, 1), lambda c: (c, 0)),
                pl.BlockSpec((c_block, 1), lambda c: (c, 0)),
            ],
            out_specs=pl.BlockSpec((N, c_block, HW), lambda c: (0, c, 0)),
        ),
        compiler_params=pltpu.CompilerParams(
            dimension_semantics=("parallel",)),
    )(x_k, yt_k, ws_k, wh_k, g_k, b_k)

    return out_flat.reshape(N, C, H, W)


# ---------- synthetic deterministic parameters ----------
def spectral_normalize(w, key, n_power_iterations=1, eps=1e-12):
    """nn.utils.spectral_norm-style weight normalization (power iteration on (out, -1))."""
    cout = w.shape[0]
    w_mat = w.reshape(cout, -1)
    u = jax.random.normal(key, (cout,), dtype=w.dtype)
    u = u / (jnp.linalg.norm(u) + eps)
    v = w_mat.T @ u
    for _ in range(n_power_iterations):
        v = w_mat.T @ u
        v = v / (jnp.linalg.norm(v) + eps)
        u = w_mat @ v
        u = u / (jnp.linalg.norm(u) + eps)
    sigma = u @ (w_mat @ v)
    return w / sigma


# ---------- pure-JAX reference for validation ----------
def ref_forward(x, y, w_scale, w_shift, gamma, beta, eps=1e-5):
    mean = x.mean(axis=(0, 2, 3), keepdims=True)
    var = ((x - mean) ** 2).mean(axis=(0, 2, 3), keepdims=True)   # biased, as BN training
    xn = (x - mean) / jnp.sqrt(var + eps)
    xn = gamma[None, :, None, None] * xn + beta[None, :, None, None]
    scale = 1.0 + y @ w_scale.T
    shift = y @ w_shift.T
    return scale[:, :, None, None] * xn + shift[:, :, None, None]


if __name__ == "__main__":
    N, C, H, W, Din = 2, 4, 16, 16, 32
    key = jax.random.PRNGKey(0)
    ks = jax.random.split(key, 8)

    x = jax.random.normal(ks[0], (N, C, H, W), dtype=jnp.float32)
    y = jax.random.normal(ks[1], (N, Din), dtype=jnp.float32)
    w_scale = jax.random.normal(ks[2], (C, Din), dtype=jnp.float32) * 0.2
    w_shift = jax.random.normal(ks[3], (C, Din), dtype=jnp.float32) * 0.2
    bn_gamma = 1.0 + 0.1 * jax.random.normal(ks[4], (C,), dtype=jnp.float32)
    bn_beta = 0.1 * jax.random.normal(ks[5], (C,), dtype=jnp.float32)

    # spectral_norm wrappers (1 power iteration, PyTorch default)
    w_scale = spectral_normalize(w_scale, ks[6])
    w_shift = spectral_normalize(w_shift, ks[7])

    out = class_conditional_batchnorm2d(x, y, w_scale, w_shift, bn_gamma, bn_beta)
    out = jax.block_until_ready(out)

    ref = ref_forward(x, y, w_scale, w_shift, bn_gamma, bn_beta)
    np.testing.assert_allclose(np.asarray(out), np.asarray(ref), rtol=1e-3, atol=1e-3)
    print("KERNEL_OK")
</pallas_src>

<mosaic_0001>
module attributes {stable_mosaic.version = 11 : i64} {
  func.func @_ccbn_kernel(%arg0: i32, %arg1: memref<2x4x256xf32, #tpu.memory_space<vmem>>, %arg2: memref<32x2xf32, #tpu.memory_space<vmem>>, %arg3: memref<4x32xf32, #tpu.memory_space<vmem>>, %arg4: memref<4x32xf32, #tpu.memory_space<vmem>>, %arg5: memref<4x1xf32, #tpu.memory_space<vmem>>, %arg6: memref<4x1xf32, #tpu.memory_space<vmem>>, %arg7: memref<2x4x256xf32, #tpu.memory_space<vmem>>) attributes {dimension_semantics = [#tpu.dimension_semantics<parallel>], iteration_bounds = array<i64: 1>, scalar_prefetch = 0 : i64, scratch_operands = 0 : i64, tpu.core_type = #tpu.core_type<tc>, window_params = [{transform_indices = @transform_0, window_bounds = array<i64: 2, 4, 256>}, {pipeline_mode = #tpu.pipeline_mode<synchronous>, transform_indices = @transform_1, window_bounds = array<i64: 32, 2>}, {transform_indices = @transform_2, window_bounds = array<i64: 4, 32>}, {transform_indices = @transform_3, window_bounds = array<i64: 4, 32>}, {transform_indices = @transform_4, window_bounds = array<i64: 4, 1>}, {transform_indices = @transform_5, window_bounds = array<i64: 4, 1>}, {transform_indices = @transform_6, window_bounds = array<i64: 2, 4, 256>}]} {
    %c0 = arith.constant 0 : index
    %c0_0 = arith.constant 0 : index
    %c0_1 = arith.constant 0 : index
    %0 = vector.load %arg1[%c0, %c0_0, %c0_1] : memref<2x4x256xf32, #tpu.memory_space<vmem>>, vector<1x4x256xf32>
    %1 = vector.shape_cast %0 : vector<1x4x256xf32> to vector<4x256xf32>
    %c1 = arith.constant 1 : index
    %c0_2 = arith.constant 0 : index
    %c0_3 = arith.constant 0 : index
    %2 = vector.load %arg1[%c1, %c0_2, %c0_3] : memref<2x4x256xf32, #tpu.memory_space<vmem>>, vector<1x4x256xf32>
    %3 = vector.shape_cast %2 : vector<1x4x256xf32> to vector<4x256xf32>
    %cst = arith.constant 0.000000e+00 : f32
    %4 = vector.broadcast %cst : f32 to vector<4x1xf32>
    %cst_4 = arith.constant 0.000000e+00 : f32
    %5 = vector.broadcast %cst_4 : f32 to vector<4x1xf32>
    %cst_5 = arith.constant dense<0.000000e+00> : vector<4xf32>
    %6 = vector.multi_reduction <add>, %1, %cst_5 [1] : vector<4x256xf32> to vector<4xf32>
    %7 = vector.shape_cast %6 : vector<4xf32> to vector<4x1xf32>
    %8 = arith.addf %4, %7 : vector<4x1xf32>
    %9 = arith.mulf %1, %1 : vector<4x256xf32>
    %cst_6 = arith.constant dense<0.000000e+00> : vector<4xf32>
    %10 = vector.multi_reduction <add>, %9, %cst_6 [1] : vector<4x256xf32> to vector<4xf32>
    %11 = vector.shape_cast %10 : vector<4xf32> to vector<4x1xf32>
    %12 = arith.addf %5, %11 : vector<4x1xf32>
    %cst_7 = arith.constant dense<0.000000e+00> : vector<4xf32>
    %13 = vector.multi_reduction <add>, %3, %cst_7 [1] : vector<4x256xf32> to vector<4xf32>
    %14 = vector.shape_cast %13 : vector<4xf32> to vector<4x1xf32>
    %15 = arith.addf %8, %14 : vector<4x1xf32>
    %16 = arith.mulf %3, %3 : vector<4x256xf32>
    %cst_8 = arith.constant dense<0.000000e+00> : vector<4xf32>
    %17 = vector.multi_reduction <add>, %16, %cst_8 [1] : vector<4x256xf32> to vector<4xf32>
    %18 = vector.shape_cast %17 : vector<4xf32> to vector<4x1xf32>
    %19 = arith.addf %12, %18 : vector<4x1xf32>
    %cst_9 = arith.constant 0.001953125 : f32
    %20 = vector.broadcast %cst_9 : f32 to vector<4x1xf32>
    %21 = arith.mulf %15, %20 : vector<4x1xf32>
    %cst_10 = arith.constant 0.001953125 : f32
    %22 = vector.broadcast %cst_10 : f32 to vector<4x1xf32>
    %23 = arith.mulf %19, %22 : vector<4x1xf32>
    %24 = arith.mulf %21, %21 : vector<4x1xf32>
    %25 = arith.subf %23, %24 : vector<4x1xf32>
    %cst_11 = arith.constant 9.99999974E-6 : f32
    %26 = vector.broadcast %cst_11 : f32 to vector<4x1xf32>
    %27 = arith.addf %25, %26 : vector<4x1xf32>
    %28 = math.rsqrt %27 : vector<4x1xf32>
    %c0_12 = arith.constant 0 : index
    %c0_13 = arith.constant 0 : index
    %29 = vector.load %arg5[%c0_12, %c0_13] : memref<4x1xf32, #tpu.memory_space<vmem>>, vector<4x1xf32>
    %30 = arith.mulf %29, %28 : vector<4x1xf32>
    %c0_14 = arith.constant 0 : index
    %c0_15 = arith.constant 0 : index
    %31 = vector.load %arg6[%c0_14, %c0_15] : memref<4x1xf32, #tpu.memory_space<vmem>>, vector<4x1xf32>
    %32 = arith.mulf %30, %21 : vector<4x1xf32>
    %33 = arith.subf %31, %32 : vector<4x1xf32>
    %c0_16 = arith.constant 0 : index
    %c0_17 = arith.constant 0 : index
    %34 = vector.load %arg2[%c0_16, %c0_17] : memref<32x2xf32, #tpu.memory_space<vmem>>, vector<32x2xf32>
    %c0_18 = arith.constant 0 : index
    %c0_19 = arith.constant 0 : index
    %35 = vector.load %arg3[%c0_18, %c0_19] : memref<4x32xf32, #tpu.memory_space<vmem>>, vector<4x32xf32>
    %cst_20 = arith.constant dense<0.000000e+00> : vector<4x2xf32>
    %36 = tpu.matmul %35, %34, %cst_20 {dimension_numbers = #tpu.dot_dimension_numbers<[1], [0], [0], [1], [0, 0, 1, 1], [], []>} : vector<4x32xf32>, vector<32x2xf32>, vector<4x2xf32> -> vector<4x2xf32>
    %cst_21 = arith.constant 1.000000e+00 : f32
    %37 = vector.broadcast %cst_21 : f32 to vector<4x2xf32>
    %38 = arith.addf %37, %36 : vector<4x2xf32>
    %c0_22 = arith.constant 0 : index
    %c0_23 = arith.constant 0 : index
    %39 = vector.load %arg4[%c0_22, %c0_23] : memref<4x32xf32, #tpu.memory_space<vmem>>, vector<4x32xf32>
    %cst_24 = arith.constant dense<0.000000e+00> : vector<4x2xf32>
    %40 = tpu.matmul %39, %34, %cst_24 {dimension_numbers = #tpu.dot_dimension_numbers<[1], [0], [0], [1], [0, 0, 1, 1], [], []>} : vector<4x32xf32>, vector<32x2xf32>, vector<4x2xf32> -> vector<4x2xf32>
    %41 = vector.extract_strided_slice %38 {offsets = [0, 0], sizes = [4, 1], strides = [1, 1]} : vector<4x2xf32> to vector<4x1xf32>
    %42 = arith.mulf %41, %30 : vector<4x1xf32>
    %43 = arith.mulf %41, %33 : vector<4x1xf32>
    %44 = vector.extract_strided_slice %40 {offsets = [0, 0], sizes = [4, 1], strides = [1, 1]} : vector<4x2xf32> to vector<4x1xf32>
    %45 = arith.addf %43, %44 : vector<4x1xf32>
    %46 = vector.broadcast %42 : vector<4x1xf32> to vector<4x256xf32>
    %47 = arith.mulf %46, %1 : vector<4x256xf32>
    %48 = vector.broadcast %45 : vector<4x1xf32> to vector<4x256xf32>
    %49 = arith.addf %47, %48 : vector<4x256xf32>
    %c0_25 = arith.constant 0 : index
    %c0_26 = arith.constant 0 : index
    %c0_27 = arith.constant 0 : index
    %50 = vector.load %arg7[%c0_25, %c0_26, %c0_27] : memref<2x4x256xf32, #tpu.memory_space<vmem>>, vector<1x4x256xf32>
    %51 = vector.shape_cast %50 : vector<1x4x256xf32> to vector<4x256xf32>
    %52 = vector.shape_cast %49 : vector<4x256xf32> to vector<1x4x256xf32>
    tpu.vector_store %arg7[%c0_25, %c0_26, %c0_27], %52 {strides = array<i32>} : memref<2x4x256xf32, #tpu.memory_space<vmem>>, vector<1x4x256xf32>,
    %53 = vector.extract_strided_slice %38 {offsets = [0, 1], sizes = [4, 1], strides = [1, 1]} : vector<4x2xf32> to vector<4x1xf32>
    %54 = arith.mulf %53, %30 : vector<4x1xf32>
    %55 = arith.mulf %53, %33 : vector<4x1xf32>
    %56 = vector.extract_strided_slice %40 {offsets = [0, 1], sizes = [4, 1], strides = [1, 1]} : vector<4x2xf32> to vector<4x1xf32>
    %57 = arith.addf %55, %56 : vector<4x1xf32>
    %58 = vector.broadcast %54 : vector<4x1xf32> to vector<4x256xf32>
    %59 = arith.mulf %58, %3 : vector<4x256xf32>
    %60 = vector.broadcast %57 : vector<4x1xf32> to vector<4x256xf32>
    %61 = arith.addf %59, %60 : vector<4x256xf32>
    %c1_28 = arith.constant 1 : index
    %c0_29 = arith.constant 0 : index
    %c0_30 = arith.constant 0 : index
    %62 = vector.load %arg7[%c1_28, %c0_29, %c0_30] : memref<2x4x256xf32, #tpu.memory_space<vmem>>, vector<1x4x256xf32>
    %63 = vector.shape_cast %62 : vector<1x4x256xf32> to vector<4x256xf32>
    %64 = vector.shape_cast %61 : vector<4x256xf32> to vector<1x4x256xf32>
    tpu.vector_store %arg7[%c1_28, %c0_29, %c0_30], %64 {strides = array<i32>} : memref<2x4x256xf32, #tpu.memory_space<vmem>>, vector<1x4x256xf32>,
    return
  }
  func.func @transform_0(%arg0: i32) -> (i32, i32, i32) {
    %c0_i32 = arith.constant 0 : i32
    %c0_i32_0 = arith.constant 0 : i32
    %c0_i32_1 = arith.constant 0 : i32
    return %c0_i32, %arg0, %c0_i32_0 : i32, i32, i32
  }
  func.func @transform_1(%arg0: i32) -> (i32, i32) {
    %c0_i32 = arith.constant 0 : i32
    %c0_i32_0 = arith.constant 0 : i32
    %c0_i32_1 = arith.constant 0 : i32
    return %c0_i32, %c0_i32_0 : i32, i32
  }
  func.func @transform_2(%arg0: i32) -> (i32, i32) {
    %c0_i32 = arith.constant 0 : i32
    %c0_i32_0 = arith.constant 0 : i32
    return %arg0, %c0_i32 : i32, i32
  }
  func.func @transform_3(%arg0: i32) -> (i32, i32) {
    %c0_i32 = arith.constant 0 : i32
    %c0_i32_0 = arith.constant 0 : i32
    return %arg0, %c0_i32 : i32, i32
  }
  func.func @transform_4(%arg0: i32) -> (i32, i32) {
    %c0_i32 = arith.constant 0 : i32
    %c0_i32_0 = arith.constant 0 : i32
    return %arg0, %c0_i32 : i32, i32
  }
  func.func @transform_5(%arg0: i32) -> (i32, i32) {
    %c0_i32 = arith.constant 0 : i32
    %c0_i32_0 = arith.constant 0 : i32
    return %arg0, %c0_i32 : i32, i32
  }
  func.func @transform_6(%arg0: i32) -> (i32, i32, i32) {
    %c0_i32 = arith.constant 0 : i32
    %c0_i32_0 = arith.constant 0 : i32
    %c0_i32_1 = arith.constant 0 : i32
    return %c0_i32, %arg0, %c0_i32_0 : i32, i32, i32
  }
}

</mosaic_0001>

<bundles_post_ra>
// kernel: tpu_custom_call.1
= control target key start
LH: loop header
LB: loop body
LE: loop exit
PB: predicated region body
PF: predicated region fallthrough
CT: control target
= control target key end

     0   :  { %vm30_vm0 = vcmask 1043456   ;;  %v372_v1 = vmov 0.0   ;;  %s484_s0 = inlined_call_operand.vmem [shape: f32[2,4,256], index: 0, kind: input, shape index: {}]   ;;  %s485_s1 = inlined_call_operand.vmem [shape: f32[32,2], index: 1, kind: input, shape index: {}]   ;;  %s486_s2 = inlined_call_operand.vmem [shape: f32[4,32], index: 2, kind: input, shape index: {}]   ;;  %s487_s3 = inlined_call_operand.vmem [shape: f32[4,32], index: 3, kind: input, shape index: {}]   ;;  %s488_s4 = inlined_call_operand.vmem [shape: f32[4,1], index: 4, kind: input, shape index: {}]   ;;  %s489_s5 = inlined_call_operand.vmem [shape: f32[4,1], index: 5, kind: input, shape index: {}]   ;;  %s490_s6 = inlined_call_operand.hbm [shape: f32[2,4,256], index: 6, kind: output, shape index: {}]  }
   0x1   :  { %v80_v0 = vld [vmem:[%s485_s1 + $0x18] sm:$0xff]  ;;  %312 = vmatprep.subr.mxu0 %v372_v1  ;;  %v79_v2 = vld [vmem:[%s485_s1 + $0x10] sm:$0xff]  ;;  %323 = vmatprep.subr.mxu1 %v372_v1  ;;  %v424_v3 = vld [vmem:[%s484_s0] sm:$0xff] }
   0x2   :  { %313 = vmatpush3.msra.mxu0 %v80_v0  ;;  %324 = vmatpush3.msra.mxu1 %v80_v0  ;;  %v428_v4 = vcombine.high %v424_v3, %v424_v3  ;;  %v31_v5 = vsel %vm30_vm0, %v424_v3, 0.0  ;;  %v37_v6 = vmul.f32 %v424_v3, %v424_v3  ;;  %v437_v7 = vld [vmem:[%s484_s0 + $0x8] sm:$0xff] }
   0x3   :  { %11 = vsyncpa [#allocation3], 0  ;;  %314 = vmatprep.subr.mxu0 %v372_v1  ;;  %v78_v8 = vld [vmem:[%s485_s1 + $0x8] sm:$0xff]  ;;  %325 = vmatprep.subr.mxu1 %v372_v1  ;;  %v444_v9 = vcombine.high %v437_v7, %v437_v7  ;;  %v56_v10 = vmul.f32 %v437_v7, %v437_v7  ;;  %vm373_vm1 = vmmov 0   ;;  %v50_v14 = vsel %vm30_vm0, %v437_v7, 0.0  ;;  %v77_v16 = vld [vmem:[%s485_s1] sm:$0xff] }
   0x4   :  { %315 = vmatpush3.msra.mxu0 %v79_v2  ;;  %v32_v11 = vsel %vm30_vm0, %v428_v4, 0.0  ;;  %320 = vmatprep.mubr.msk.f32.mxu0 %vm373_vm1, %v372_v1  ;;  %v39_v12 = vcombine.high %v37_v6, %v37_v6  ;;  %v41_v13 = vsel %vm30_vm0, %v37_v6, 0.0  ;;  %v81_v20 = vld [vmem:[%s486_s2] sm:$0xf]  ;;  %vm82_vm2 = vcmask 261120   ;;  %s375_s13 = smov 1  }
   0x5   :  { %316 = vmatprep.subr.mxu0 %v372_v1  ;;  %v33_v15 = vadd.f32 %v32_v11, %v31_v5  ;;  %326 = vmatpush3.msra.mxu1 %v79_v2  ;;  %v51_v17 = vsel %vm30_vm0, %v444_v9, 0.0  ;;  %v58_v18 = vcombine.high %v56_v10, %v56_v10  ;;  %v60_v21 = vsel %vm30_vm0, %v56_v10, 0.0  ;;  %v156_v26 = vld [vmem:[%s487_s3] sm:$0xf] }
   0x6   :  { %317 = vmatpush3.msra.mxu0 %v78_v8  ;;  %v42_v19 = vsel %vm30_vm0, %v39_v12, 0.0  ;;  %327 = vmatprep.subr.mxu1 %v372_v1  ;;  %v52_v23 = vadd.f32 %v51_v17, %v50_v14  ;;  %v374_v27 = vmov 0   ;;  %v72_v39 = vld [vmem:[%s488_s4] sm:$0xf]  ;;  %v376_v53 = vmov 1   ;;  %s377_s4 = smov [#allocation2]  }
   0x7   :  { %34 = vadd.xlane.f32.xlu0 %v33_v15  ;;  %318 = vmatprep.subr.mxu0 %v372_v1  ;;  %v43_v22 = vadd.f32 %v42_v19, %v41_v13  ;;  %v61_v24 = vsel %vm30_vm0, %v58_v18, 0.0  ;;  %v74_v42 = vld [vmem:[%s489_s5] sm:$0xf]  ;;  %s288_s5 = sshll.u32 %s377_s4, 4  ;;  %s289_s5 = int_to_ptr.vmem [resolvable:$true] %s288_s5 }
   0x8   :  { %319 = vmatpush3.msra.mxu0 %v77_v16  ;;  %328 = vmatpush3.msra.mxu1 %v78_v8  ;;  %v62_v25 = vadd.f32 %v61_v24, %v60_v21  ;;  %s350_s14 = scalar_lea.vmem %s289_s5, 256  ;;  %p355_p1 = scmp.lt.s32.totalorder %s289_s5, %s289_s5 }
   0x9   :  { %44 = vadd.xlane.f32.xlu1 %v43_v22  ;;  %321 = vmatmul.mubr.msk.f32.vlgmr.msra.gmra.mxu0 %vm82_vm2, %v81_v20  ;;  %p351_p0 = scmp.ne.s32.totalorder %s289_s5, %s350_s14  ;;  %p356_p2 = scmp.lt.s32.totalorder %s350_s14, %s350_s14 }
   0xa   :  { %329 = vmatprep.subr.mxu1 %v372_v1  ;;  %331 = vmatprep.mubr.msk.f32.mxu1 %vm373_vm1, %v372_v1 }
   0xb   :  { %53 = vadd.xlane.f32.xlu0 %v52_v23  ;;  %330 = vmatpush3.msra.mxu1 %v77_v16  ;;  %p357_p3 = por %p356_p2, %p355_p1 }
   0xc   :  { %332 = vmatmul.mubr.msk.f32.vlgmr.msra.gmra.mxu1 %vm82_vm2, %v156_v26  ;;  %342 = vset.pattern.permute.xlu1 %v374_v27 }
   0xd   :  { %63 = vadd.xlane.f32.xlu1 %v62_v25  ;;  %344 = vset.pattern.permute.xlu0 %v374_v27  ;;  %p358_p4 = pnand %p357_p3, %p351_p0 }
  0x90   :  { %v35_v28 = vpop.xlane.xlu0 %34 }
  0x92   :  { %v45_v29 = vpop.xlane.xlu1 %44 }
  0x94   :  { %v54_v30 = vpop.xlane.xlu0 %53 }
  0x95   :  { %v55_v31 = vadd.f32 %v54_v30, %v35_v28 }
  0x96   :  { %v64_v32 = vpop.xlane.xlu1 %63 }
  0x97   :  { %v66_v33 = vmul.f32 0.001953125, %v55_v31  ;;  %v65_v34 = vadd.f32 %v64_v32, %v45_v29 }
  0x99   :  { %v68_v35 = vmul.f32 %v66_v33, %v66_v33  ;;  %v67_v36 = vmul.f32 0.001953125, %v65_v34 }
  0x9b   :  { %v69_v37 = vsub.f32 %v67_v36, %v68_v35 }
  0x9d   :  { %v70_v38 = vadd.f32 1e-05, %v69_v37 }
  0x9f   :  { %348 = vrsqrt.f32 %v70_v38 }
  0xac   :  { %v349_v40 = vpop.eup %348 }
  0xad   :  { %v73_v41 = vmul.f32 %v349_v40, %v72_v39 }
  0xaf   :  { %253 = vrot.lane.b32.xlu0 %v73_v41, %s375_s13  ;;  %v75_v43 = vmul.f32 %v73_v41, %v66_v33 }
  0xb1   :  { %v76_v44 = vsub.f32 %v74_v42, %v75_v43 }
  0xb3   :  { %258 = vrot.lane.b32.xlu1 %v76_v44, %s375_s13 }
  0xc9   :  { %v152_v45 = vpop.f32.mrf.mxu0 }
  0xca   :  { %v153_v46 = vadd.f32 1.0, %v152_v45 }
  0xcb   :  { %v322_v47 = vpop.f32.mrf.mxu0 }
  0xcc   :  { %v226_v48 = vpop.f32.mrf.mxu1  ;;  %v231_v49 = vmul.f32 %v153_v46, %v76_v44  ;;  %v230_v50 = vmul.f32 %v153_v46, %v73_v41 }
  0xce   :  { %v232_v51 = vadd.f32 %v231_v49, %v226_v48  ;;  %235 = vperm.xlu1 %342, %v230_v50   ;;  %v333_v52 = vpop.f32.mrf.mxu1 }
  0xd0   :  { %242 = vperm.xlu0 %344, %v232_v51  }
  0xd2   :  { %343 = vset.pattern.permute.xlu1 %v376_v53 }
  0xd4   :  { %345 = vset.pattern.permute.xlu0 %v376_v53 }
 0x121   :  { %v254_v54 = vpop.permute.xlu0 %253 }
 0x122   :  { %v256_v55 = vmul.f32 %v254_v54, %v153_v46 }
 0x124   :  { %265 = vperm.xlu1 %343, %v256_v55  }
 0x125   :  { %v259_v56 = vpop.permute.xlu1 %258 }
 0x126   :  { %v261_v57 = vmul.f32 %v259_v56, %v153_v46 }
 0x128   :  { %v262_v58 = vadd.f32 %v261_v57, %v226_v48 }
 0x12a   :  { %272 = vperm.xlu1 %343, %v262_v58  }
 0x149   :  { %v236_v59 = vpop.permute.xlu1 %235 }
 0x14a   :  { %v238_v60 = vmul.f32 %v236_v59, %v424_v3  ;;  %v239_v61 = vmul.f32 %v236_v59, %v428_v4 }
 0x14b   :  { %v243_v62 = vpop.permute.xlu0 %242 }
 0x14c   :  { %v245_v63 = vadd.f32 %v243_v62, %v238_v60  ;;  %v246_v0 = vadd.f32 %v243_v62, %v239_v61 }
 0x14e   :  { %v249_v1 = vcombine.low %v245_v63, %v246_v0 }
 0x150   :  { %251 = vst [vmem:[#allocation2] sm:$0xff] %v249_v1 }
 0x19f   :  { %v266_v2 = vpop.permute.xlu1 %265 }
 0x1a0   :  { %v268_v5 = vmul.f32 %v437_v7, %v266_v2  ;;  %v269_v6 = vmul.f32 %v266_v2, %v444_v9 }
 0x1a5   :  { %v273_v8 = vpop.permute.xlu1 %272 }
 0x1a6   :  { %v275_v10 = vadd.f32 %v273_v8, %v268_v5  ;;  %v276_v11 = vadd.f32 %v273_v8, %v269_v6 }
 0x1a8   :  { %v279_v12 = vcombine.low %v275_v10, %v276_v11 }
 0x1aa   :  { %282 = vst [vmem:[#allocation2 + $0x8] sm:$0xff] %v279_v12 }
 0x1ab   :  { %361 = shalt.err (!%p358_p4)
}
 0x1ac   :  { %s378_s15 = smov 128   ;;  %s379_s16 = smov 8  }
 0x1ad   :  { %294 = dma.vmem_to_hbm [thread:$0]  %s289_s5, 256, %s490_s6, [#allocation3], %s378_s15, %s378_s15, %s379_s16  }
 0x1ae   :  { %370 = dma.done.wait [#allocation3], 256  }
 0x1af   :  { %371 = vsyncadd [#allocation3], 4294967040 }
 0x1b0   :  { %298 = vsyncpa [#allocation3], 1 }

</bundles_post_ra>
